<compile_context>
chip_gen: v7x
topology: tpu7x:2x2x1
jax: 0.10.0
libtpu: 0.0.40
codegen_flags: <defaults>
</compile_context>

<pallas_src>
import jax
import jax.numpy as jnp
import numpy as np
from jax.experimental import pallas as pl
from jax.experimental.pallas import tpu as pltpu

EPS = 1e-5
NEG_SLOPE = 0.2


def convblock_kernel(xp_ref, m_ref, w1_ref, b1_ref, g1_ref, be1_ref,
                     w2_ref, b2_ref, g2_ref, be2_ref, o_ref):
    # xp_ref : (Cin, N*L + 2*pad) f32 — batch folded into lanes, edge-padded
    # m_ref  : (K, N*L) f32           — per-tap validity masks (0 where the tap
    #                                   falls in conv padding / crosses samples)
    # w*_ref : (K, Cout, Cprev) bf16  — tap-major conv weights (MXU operands)
    # b*/g*/be*_ref : (Cout, 1) f32
    # o_ref  : (Cout, N*L + 2*pad) f32 — padded output, reused as the staging
    #                                    buffer for conv2 (no scratch buffers)
    K, Cout, _ = w1_ref.shape
    NLp = o_ref.shape[1]
    pad = K // 2
    NL = NLp - 2 * pad
    inv_nl = 1.0 / float(NL)

    def lrelu(z):
        return jnp.where(z > 0, z, NEG_SLOPE * z)

    def bn(z, g_ref, be_ref):
        # Single-pass per-channel stats over the folded (N*L) lane axis.
        # Training-mode BatchNorm1d: biased variance, batch statistics.
        m = jnp.sum(z, axis=1, keepdims=True) * inv_nl
        m2 = jnp.sum(z * z, axis=1, keepdims=True) * inv_nl
        var = m2 - m * m
        return (z - m) * jax.lax.rsqrt(var + EPS) * g_ref[...] + be_ref[...]

    def conv(src_ref, w_ref, b_ref):
        # src_ref: (Cprev, N*L + 2*pad).  One MXU matmul per tap over the whole
        # folded batch; bf16 operands, f32 accumulation; bias added once.
        def tap(t):
            hh = src_ref[:, t:t + NL]
            if t != pad:                       # center tap needs no mask
                hh = hh * m_ref[t:t + 1, :]
            return jnp.dot(w_ref[t], hh.astype(jnp.bfloat16),
                           preferred_element_type=jnp.float32)
        acc = tap(0)
        for t in range(1, K):                  # short static K: stays unrolled
            acc = acc + tap(t)
        return acc + b_ref[...]

    # ---- conv1 -> LeakyReLU -> bn1 ----
    h = bn(lrelu(conv(xp_ref, w1_ref, b1_ref)), g1_ref, be1_ref)

    # Stage bn1 output in the padded output buffer (zero only the 2*pad edge
    # columns) so conv2 can read statically shifted slices of it.
    o_ref[:, 0:pad] = jnp.zeros((Cout, pad), jnp.float32)
    o_ref[:, NL + pad:NL + 2 * pad] = jnp.zeros((Cout, pad), jnp.float32)
    o_ref[:, pad:pad + NL] = h

    # ---- conv2 -> bn2 -> LeakyReLU -> bn2 (module applies bn2 twice) ----
    z = conv(o_ref, w2_ref, b2_ref)
    z = bn(z, g2_ref, be2_ref)
    z = lrelu(z)
    z = bn(z, g2_ref, be2_ref)
    o_ref[:, 0:NL] = z            # lane-aligned final store; wrapper takes [:NL]


def conv_block(x, params):
    (w1, b1, g1, be1, w2, b2, g2, be2) = params
    N, Cin, L = x.shape
    Cout, _, K = w1.shape
    assert K % 2 == 1, "same-padding Conv1d path assumes odd kernel_size"
    pad = K // 2
    NL = N * L

    # Fold batch into the lane axis (lane-dense layout) and edge-pad the flat
    # length by `pad` on each side so every tap is a static lane slice.
    x_flat = jnp.transpose(x, (1, 0, 2)).reshape(Cin, NL)
    xp = jnp.pad(x_flat, ((0, 0), (pad, pad)))

    # Per-tap validity masks: position p within a sample contributes for tap t
    # iff 0 <= p + t - pad < L (otherwise it is conv zero-padding, or would
    # leak across the sample boundary in the folded layout).
    pos = np.arange(NL) % L
    masks = jnp.asarray(np.stack(
        [((pos + t - pad >= 0) & (pos + t - pad < L)).astype(np.float32)
         for t in range(K)], axis=0))

    # Tap-major bf16 weights for the MXU; accumulation stays f32 in-kernel.
    w1k = jnp.transpose(w1, (2, 0, 1)).astype(jnp.bfloat16)   # (K, Cout, Cin)
    w2k = jnp.transpose(w2, (2, 0, 1)).astype(jnp.bfloat16)   # (K, Cout, Cout)
    col = lambda v: v.reshape(Cout, 1).astype(jnp.float32)

    vspec = pl.BlockSpec(memory_space=pltpu.MemorySpace.VMEM)
    out_padded = pl.pallas_call(
        convblock_kernel,
        out_shape=jax.ShapeDtypeStruct((Cout, NL + 2 * pad), jnp.float32),
        in_specs=[vspec] * 10,
        out_specs=vspec,
        compiler_params=pltpu.CompilerParams(
            vmem_limit_bytes=32 * 1024 * 1024),
    )(xp, masks, w1k, col(b1), col(g1), col(be1),
      w2k, col(b2), col(g2), col(be2))

    # (Cout, N*L) -> (N, Cout, L)
    return jnp.transpose(out_padded[:, :NL].reshape(Cout, N, L), (1, 0, 2))


def ref_forward(x, params):
    """Pure-JAX f32 reference mirroring the PyTorch forward (training-mode BN)."""
    (w1, b1, g1, be1, w2, b2, g2, be2) = params
    K = w1.shape[2]
    pad = K // 2

    def conv1d(h, w, b):
        y = jax.lax.conv_general_dilated(
            h, w, window_strides=(1,), padding=[(pad, pad)],
            dimension_numbers=("NCH", "OIH", "NCH"))
        return y + b[None, :, None]

    def bn(h, g, be):
        m = h.mean(axis=(0, 2), keepdims=True)
        v = ((h - m) ** 2).mean(axis=(0, 2), keepdims=True)
        return (h - m) / jnp.sqrt(v + EPS) * g[None, :, None] + be[None, :, None]

    def lrelu(h):
        return jnp.where(h > 0, h, NEG_SLOPE * h)

    h = conv1d(x, w1, b1)
    h = lrelu(h)
    h = bn(h, g1, be1)
    h = conv1d(h, w2, b2)
    h = bn(h, g2, be2)
    h = lrelu(h)
    h = bn(h, g2, be2)
    return h


if __name__ == "__main__":
    N, Cin, Cout, L, K = 2, 4, 8, 16, 3

    key = jax.random.PRNGKey(0)
    kx, kw1, kb1, kw2, kb2 = jax.random.split(key, 5)

    x = jax.random.normal(kx, (N, Cin, L), dtype=jnp.float32)

    # deterministic synthetic parameters (shapes follow nn.Conv1d / nn.BatchNorm1d)
    w1 = jax.random.normal(kw1, (Cout, Cin, K), dtype=jnp.float32) * 0.1
    b1 = jax.random.normal(kb1, (Cout,), dtype=jnp.float32) * 0.1
    w2 = jax.random.normal(kw2, (Cout, Cout, K), dtype=jnp.float32) * 0.1
    b2 = jax.random.normal(kb2, (Cout,), dtype=jnp.float32) * 0.1
    g1 = jnp.ones((Cout,), jnp.float32)
    be1 = jnp.zeros((Cout,), jnp.float32)
    g2 = jnp.ones((Cout,), jnp.float32)
    be2 = jnp.zeros((Cout,), jnp.float32)
    params = (w1, b1, g1, be1, w2, b2, g2, be2)

    out = conv_block(x, params)
    out = jax.block_until_ready(out)

    ref = ref_forward(x, params)
    # Tolerance reflects bf16 MXU operands (f32 accumulation) vs. the pure-f32
    # reference; structural errors would be O(1), far beyond this.
    np.testing.assert_allclose(np.asarray(out), np.asarray(ref),
                               rtol=3e-2, atol=2e-2)
    print("KERNEL_OK")
</pallas_src>

<mosaic_0001>
module attributes {stable_mosaic.version = 11 : i64} {
  func.func @convblock_kernel(%arg0: memref<4x34xf32, #tpu.memory_space<vmem>>, %arg1: memref<3x32xf32, #tpu.memory_space<vmem>>, %arg2: memref<3x8x4xbf16, #tpu.memory_space<vmem>>, %arg3: memref<8x1xf32, #tpu.memory_space<vmem>>, %arg4: memref<8x1xf32, #tpu.memory_space<vmem>>, %arg5: memref<8x1xf32, #tpu.memory_space<vmem>>, %arg6: memref<3x8x8xbf16, #tpu.memory_space<vmem>>, %arg7: memref<8x1xf32, #tpu.memory_space<vmem>>, %arg8: memref<8x1xf32, #tpu.memory_space<vmem>>, %arg9: memref<8x1xf32, #tpu.memory_space<vmem>>, %arg10: memref<8x34xf32, #tpu.memory_space<vmem>>) attributes {dimension_semantics = [], scalar_prefetch = 0 : i64, scratch_operands = 0 : i64, tpu.core_type = #tpu.core_type<tc>} {
    %c0 = arith.constant 0 : index
    %c0_0 = arith.constant 0 : index
    %0 = vector.load %arg0[%c0, %c0_0] : memref<4x34xf32, #tpu.memory_space<vmem>>, vector<4x32xf32>
    %c0_1 = arith.constant 0 : index
    %c0_2 = arith.constant 0 : index
    %1 = vector.load %arg1[%c0_1, %c0_2] : memref<3x32xf32, #tpu.memory_space<vmem>>, vector<1x32xf32>
    %2 = vector.broadcast %1 : vector<1x32xf32> to vector<4x32xf32>
    %3 = arith.mulf %0, %2 : vector<4x32xf32>
    %c0_3 = arith.constant 0 : index
    %c0_4 = arith.constant 0 : index
    %c0_5 = arith.constant 0 : index
    %4 = vector.load %arg2[%c0_3, %c0_4, %c0_5] : memref<3x8x4xbf16, #tpu.memory_space<vmem>>, vector<1x8x4xbf16>
    %5 = vector.shape_cast %4 : vector<1x8x4xbf16> to vector<8x4xbf16>
    %6 = arith.truncf %3 : vector<4x32xf32> to vector<4x32xbf16>
    %cst = arith.constant dense<0.000000e+00> : vector<8x32xf32>
    %7 = tpu.matmul %5, %6, %cst {dimension_numbers = #tpu.dot_dimension_numbers<[1], [0], [0], [1], [0, 0, 1, 1], [], []>} : vector<8x4xbf16>, vector<4x32xbf16>, vector<8x32xf32> -> vector<8x32xf32>
    %c0_6 = arith.constant 0 : index
    %c1 = arith.constant 1 : index
    %8 = vector.load %arg0[%c0_6, %c1] : memref<4x34xf32, #tpu.memory_space<vmem>>, vector<4x32xf32>
    %c1_7 = arith.constant 1 : index
    %c0_8 = arith.constant 0 : index
    %c0_9 = arith.constant 0 : index
    %9 = vector.load %arg2[%c1_7, %c0_8, %c0_9] : memref<3x8x4xbf16, #tpu.memory_space<vmem>>, vector<1x8x4xbf16>
    %10 = vector.shape_cast %9 : vector<1x8x4xbf16> to vector<8x4xbf16>
    %11 = arith.truncf %8 : vector<4x32xf32> to vector<4x32xbf16>
    %cst_10 = arith.constant dense<0.000000e+00> : vector<8x32xf32>
    %12 = tpu.matmul %10, %11, %cst_10 {dimension_numbers = #tpu.dot_dimension_numbers<[1], [0], [0], [1], [0, 0, 1, 1], [], []>} : vector<8x4xbf16>, vector<4x32xbf16>, vector<8x32xf32> -> vector<8x32xf32>
    %13 = arith.addf %7, %12 : vector<8x32xf32>
    %c0_11 = arith.constant 0 : index
    %c2 = arith.constant 2 : index
    %14 = vector.load %arg0[%c0_11, %c2] : memref<4x34xf32, #tpu.memory_space<vmem>>, vector<4x32xf32>
    %c2_12 = arith.constant 2 : index
    %c0_13 = arith.constant 0 : index
    %15 = vector.load %arg1[%c2_12, %c0_13] : memref<3x32xf32, #tpu.memory_space<vmem>>, vector<1x32xf32>
    %16 = vector.broadcast %15 : vector<1x32xf32> to vector<4x32xf32>
    %17 = arith.mulf %14, %16 : vector<4x32xf32>
    %c2_14 = arith.constant 2 : index
    %c0_15 = arith.constant 0 : index
    %c0_16 = arith.constant 0 : index
    %18 = vector.load %arg2[%c2_14, %c0_15, %c0_16] : memref<3x8x4xbf16, #tpu.memory_space<vmem>>, vector<1x8x4xbf16>
    %19 = vector.shape_cast %18 : vector<1x8x4xbf16> to vector<8x4xbf16>
    %20 = arith.truncf %17 : vector<4x32xf32> to vector<4x32xbf16>
    %cst_17 = arith.constant dense<0.000000e+00> : vector<8x32xf32>
    %21 = tpu.matmul %19, %20, %cst_17 {dimension_numbers = #tpu.dot_dimension_numbers<[1], [0], [0], [1], [0, 0, 1, 1], [], []>} : vector<8x4xbf16>, vector<4x32xbf16>, vector<8x32xf32> -> vector<8x32xf32>
    %22 = arith.addf %13, %21 : vector<8x32xf32>
    %c0_18 = arith.constant 0 : index
    %c0_19 = arith.constant 0 : index
    %23 = vector.load %arg3[%c0_18, %c0_19] : memref<8x1xf32, #tpu.memory_space<vmem>>, vector<8x1xf32>
    %24 = vector.broadcast %23 : vector<8x1xf32> to vector<8x32xf32>
    %25 = arith.addf %22, %24 : vector<8x32xf32>
    %cst_20 = arith.constant 0.000000e+00 : f32
    %26 = vector.broadcast %cst_20 : f32 to vector<8x32xf32>
    %27 = arith.cmpf ogt, %25, %26 : vector<8x32xf32>
    %cst_21 = arith.constant 2.000000e-01 : f32
    %28 = vector.broadcast %cst_21 : f32 to vector<8x32xf32>
    %29 = arith.mulf %28, %25 : vector<8x32xf32>
    %30 = arith.select %27, %25, %29 : vector<8x32xi1>, vector<8x32xf32>
    %cst_22 = arith.constant dense<0.000000e+00> : vector<8xf32>
    %31 = vector.multi_reduction <add>, %30, %cst_22 [1] : vector<8x32xf32> to vector<8xf32>
    %32 = vector.shape_cast %31 : vector<8xf32> to vector<8x1xf32>
    %cst_23 = arith.constant 3.125000e-02 : f32
    %33 = vector.broadcast %cst_23 : f32 to vector<8x1xf32>
    %34 = arith.mulf %32, %33 : vector<8x1xf32>
    %35 = arith.mulf %30, %30 : vector<8x32xf32>
    %cst_24 = arith.constant dense<0.000000e+00> : vector<8xf32>
    %36 = vector.multi_reduction <add>, %35, %cst_24 [1] : vector<8x32xf32> to vector<8xf32>
    %37 = vector.shape_cast %36 : vector<8xf32> to vector<8x1xf32>
    %cst_25 = arith.constant 3.125000e-02 : f32
    %38 = vector.broadcast %cst_25 : f32 to vector<8x1xf32>
    %39 = arith.mulf %37, %38 : vector<8x1xf32>
    %40 = arith.mulf %34, %34 : vector<8x1xf32>
    %41 = arith.subf %39, %40 : vector<8x1xf32>
    %42 = vector.broadcast %34 : vector<8x1xf32> to vector<8x32xf32>
    %43 = arith.subf %30, %42 : vector<8x32xf32>
    %cst_26 = arith.constant 9.99999974E-6 : f32
    %44 = vector.broadcast %cst_26 : f32 to vector<8x1xf32>
    %45 = arith.addf %41, %44 : vector<8x1xf32>
    %46 = math.rsqrt %45 : vector<8x1xf32>
    %47 = vector.broadcast %46 : vector<8x1xf32> to vector<8x32xf32>
    %48 = arith.mulf %43, %47 : vector<8x32xf32>
    %c0_27 = arith.constant 0 : index
    %c0_28 = arith.constant 0 : index
    %49 = vector.load %arg4[%c0_27, %c0_28] : memref<8x1xf32, #tpu.memory_space<vmem>>, vector<8x1xf32>
    %50 = vector.broadcast %49 : vector<8x1xf32> to vector<8x32xf32>
    %51 = arith.mulf %48, %50 : vector<8x32xf32>
    %c0_29 = arith.constant 0 : index
    %c0_30 = arith.constant 0 : index
    %52 = vector.load %arg5[%c0_29, %c0_30] : memref<8x1xf32, #tpu.memory_space<vmem>>, vector<8x1xf32>
    %53 = vector.broadcast %52 : vector<8x1xf32> to vector<8x32xf32>
    %54 = arith.addf %51, %53 : vector<8x32xf32>
    %cst_31 = arith.constant 0.000000e+00 : f32
    %55 = vector.broadcast %cst_31 : f32 to vector<8x1xf32>
    %c0_32 = arith.constant 0 : index
    %c0_33 = arith.constant 0 : index
    %56 = vector.load %arg10[%c0_32, %c0_33] : memref<8x34xf32, #tpu.memory_space<vmem>>, vector<8x1xf32>
    tpu.vector_store %arg10[%c0_32, %c0_33], %55 {strides = array<i32>} : memref<8x34xf32, #tpu.memory_space<vmem>>, vector<8x1xf32>,
    %cst_34 = arith.constant 0.000000e+00 : f32
    %57 = vector.broadcast %cst_34 : f32 to vector<8x1xf32>
    %c0_35 = arith.constant 0 : index
    %c33 = arith.constant 33 : index
    %58 = vector.load %arg10[%c0_35, %c33] : memref<8x34xf32, #tpu.memory_space<vmem>>, vector<8x1xf32>
    tpu.vector_store %arg10[%c0_35, %c33], %57 {strides = array<i32>} : memref<8x34xf32, #tpu.memory_space<vmem>>, vector<8x1xf32>,
    %c0_36 = arith.constant 0 : index
    %c1_37 = arith.constant 1 : index
    %59 = vector.load %arg10[%c0_36, %c1_37] : memref<8x34xf32, #tpu.memory_space<vmem>>, vector<8x32xf32>
    tpu.vector_store %arg10[%c0_36, %c1_37], %54 {strides = array<i32>} : memref<8x34xf32, #tpu.memory_space<vmem>>, vector<8x32xf32>,
    %c0_38 = arith.constant 0 : index
    %c0_39 = arith.constant 0 : index
    %60 = vector.load %arg10[%c0_38, %c0_39] : memref<8x34xf32, #tpu.memory_space<vmem>>, vector<8x32xf32>
    %c0_40 = arith.constant 0 : index
    %c0_41 = arith.constant 0 : index
    %61 = vector.load %arg1[%c0_40, %c0_41] : memref<3x32xf32, #tpu.memory_space<vmem>>, vector<1x32xf32>
    %62 = vector.broadcast %61 : vector<1x32xf32> to vector<8x32xf32>
    %63 = arith.mulf %60, %62 : vector<8x32xf32>
    %c0_42 = arith.constant 0 : index
    %c0_43 = arith.constant 0 : index
    %c0_44 = arith.constant 0 : index
    %64 = vector.load %arg6[%c0_42, %c0_43, %c0_44] : memref<3x8x8xbf16, #tpu.memory_space<vmem>>, vector<1x8x8xbf16>
    %65 = vector.shape_cast %64 : vector<1x8x8xbf16> to vector<8x8xbf16>
    %66 = arith.truncf %63 : vector<8x32xf32> to vector<8x32xbf16>
    %cst_45 = arith.constant dense<0.000000e+00> : vector<8x32xf32>
    %67 = tpu.matmul %65, %66, %cst_45 {dimension_numbers = #tpu.dot_dimension_numbers<[1], [0], [0], [1], [0, 0, 1, 1], [], []>} : vector<8x8xbf16>, vector<8x32xbf16>, vector<8x32xf32> -> vector<8x32xf32>
    %c0_46 = arith.constant 0 : index
    %c1_47 = arith.constant 1 : index
    %68 = vector.load %arg10[%c0_46, %c1_47] : memref<8x34xf32, #tpu.memory_space<vmem>>, vector<8x32xf32>
    %c1_48 = arith.constant 1 : index
    %c0_49 = arith.constant 0 : index
    %c0_50 = arith.constant 0 : index
    %69 = vector.load %arg6[%c1_48, %c0_49, %c0_50] : memref<3x8x8xbf16, #tpu.memory_space<vmem>>, vector<1x8x8xbf16>
    %70 = vector.shape_cast %69 : vector<1x8x8xbf16> to vector<8x8xbf16>
    %71 = arith.truncf %68 : vector<8x32xf32> to vector<8x32xbf16>
    %cst_51 = arith.constant dense<0.000000e+00> : vector<8x32xf32>
    %72 = tpu.matmul %70, %71, %cst_51 {dimension_numbers = #tpu.dot_dimension_numbers<[1], [0], [0], [1], [0, 0, 1, 1], [], []>} : vector<8x8xbf16>, vector<8x32xbf16>, vector<8x32xf32> -> vector<8x32xf32>
    %73 = arith.addf %67, %72 : vector<8x32xf32>
    %c0_52 = arith.constant 0 : index
    %c2_53 = arith.constant 2 : index
    %74 = vector.load %arg10[%c0_52, %c2_53] : memref<8x34xf32, #tpu.memory_space<vmem>>, vector<8x32xf32>
    %c2_54 = arith.constant 2 : index
    %c0_55 = arith.constant 0 : index
    %75 = vector.load %arg1[%c2_54, %c0_55] : memref<3x32xf32, #tpu.memory_space<vmem>>, vector<1x32xf32>
    %76 = vector.broadcast %75 : vector<1x32xf32> to vector<8x32xf32>
    %77 = arith.mulf %74, %76 : vector<8x32xf32>
    %c2_56 = arith.constant 2 : index
    %c0_57 = arith.constant 0 : index
    %c0_58 = arith.constant 0 : index
    %78 = vector.load %arg6[%c2_56, %c0_57, %c0_58] : memref<3x8x8xbf16, #tpu.memory_space<vmem>>, vector<1x8x8xbf16>
    %79 = vector.shape_cast %78 : vector<1x8x8xbf16> to vector<8x8xbf16>
    %80 = arith.truncf %77 : vector<8x32xf32> to vector<8x32xbf16>
    %cst_59 = arith.constant dense<0.000000e+00> : vector<8x32xf32>
    %81 = tpu.matmul %79, %80, %cst_59 {dimension_numbers = #tpu.dot_dimension_numbers<[1], [0], [0], [1], [0, 0, 1, 1], [], []>} : vector<8x8xbf16>, vector<8x32xbf16>, vector<8x32xf32> -> vector<8x32xf32>
    %82 = arith.addf %73, %81 : vector<8x32xf32>
    %c0_60 = arith.constant 0 : index
    %c0_61 = arith.constant 0 : index
    %83 = vector.load %arg7[%c0_60, %c0_61] : memref<8x1xf32, #tpu.memory_space<vmem>>, vector<8x1xf32>
    %84 = vector.broadcast %83 : vector<8x1xf32> to vector<8x32xf32>
    %85 = arith.addf %82, %84 : vector<8x32xf32>
    %cst_62 = arith.constant dense<0.000000e+00> : vector<8xf32>
    %86 = vector.multi_reduction <add>, %85, %cst_62 [1] : vector<8x32xf32> to vector<8xf32>
    %87 = vector.shape_cast %86 : vector<8xf32> to vector<8x1xf32>
    %cst_63 = arith.constant 3.125000e-02 : f32
    %88 = vector.broadcast %cst_63 : f32 to vector<8x1xf32>
    %89 = arith.mulf %87, %88 : vector<8x1xf32>
    %90 = arith.mulf %85, %85 : vector<8x32xf32>
    %cst_64 = arith.constant dense<0.000000e+00> : vector<8xf32>
    %91 = vector.multi_reduction <add>, %90, %cst_64 [1] : vector<8x32xf32> to vector<8xf32>
    %92 = vector.shape_cast %91 : vector<8xf32> to vector<8x1xf32>
    %cst_65 = arith.constant 3.125000e-02 : f32
    %93 = vector.broadcast %cst_65 : f32 to vector<8x1xf32>
    %94 = arith.mulf %92, %93 : vector<8x1xf32>
    %95 = arith.mulf %89, %89 : vector<8x1xf32>
    %96 = arith.subf %94, %95 : vector<8x1xf32>
    %97 = vector.broadcast %89 : vector<8x1xf32> to vector<8x32xf32>
    %98 = arith.subf %85, %97 : vector<8x32xf32>
    %cst_66 = arith.constant 9.99999974E-6 : f32
    %99 = vector.broadcast %cst_66 : f32 to vector<8x1xf32>
    %100 = arith.addf %96, %99 : vector<8x1xf32>
    %101 = math.rsqrt %100 : vector<8x1xf32>
    %102 = vector.broadcast %101 : vector<8x1xf32> to vector<8x32xf32>
    %103 = arith.mulf %98, %102 : vector<8x32xf32>
    %c0_67 = arith.constant 0 : index
    %c0_68 = arith.constant 0 : index
    %104 = vector.load %arg8[%c0_67, %c0_68] : memref<8x1xf32, #tpu.memory_space<vmem>>, vector<8x1xf32>
    %105 = vector.broadcast %104 : vector<8x1xf32> to vector<8x32xf32>
    %106 = arith.mulf %103, %105 : vector<8x32xf32>
    %c0_69 = arith.constant 0 : index
    %c0_70 = arith.constant 0 : index
    %107 = vector.load %arg9[%c0_69, %c0_70] : memref<8x1xf32, #tpu.memory_space<vmem>>, vector<8x1xf32>
    %108 = vector.broadcast %107 : vector<8x1xf32> to vector<8x32xf32>
    %109 = arith.addf %106, %108 : vector<8x32xf32>
    %cst_71 = arith.constant 0.000000e+00 : f32
    %110 = vector.broadcast %cst_71 : f32 to vector<8x32xf32>
    %111 = arith.cmpf ogt, %109, %110 : vector<8x32xf32>
    %cst_72 = arith.constant 2.000000e-01 : f32
    %112 = vector.broadcast %cst_72 : f32 to vector<8x32xf32>
    %113 = arith.mulf %112, %109 : vector<8x32xf32>
    %114 = arith.select %111, %109, %113 : vector<8x32xi1>, vector<8x32xf32>
    %cst_73 = arith.constant dense<0.000000e+00> : vector<8xf32>
    %115 = vector.multi_reduction <add>, %114, %cst_73 [1] : vector<8x32xf32> to vector<8xf32>
    %116 = vector.shape_cast %115 : vector<8xf32> to vector<8x1xf32>
    %cst_74 = arith.constant 3.125000e-02 : f32
    %117 = vector.broadcast %cst_74 : f32 to vector<8x1xf32>
    %118 = arith.mulf %116, %117 : vector<8x1xf32>
    %119 = arith.mulf %114, %114 : vector<8x32xf32>
    %cst_75 = arith.constant dense<0.000000e+00> : vector<8xf32>
    %120 = vector.multi_reduction <add>, %119, %cst_75 [1] : vector<8x32xf32> to vector<8xf32>
    %121 = vector.shape_cast %120 : vector<8xf32> to vector<8x1xf32>
    %cst_76 = arith.constant 3.125000e-02 : f32
    %122 = vector.broadcast %cst_76 : f32 to vector<8x1xf32>
    %123 = arith.mulf %121, %122 : vector<8x1xf32>
    %124 = arith.mulf %118, %118 : vector<8x1xf32>
    %125 = arith.subf %123, %124 : vector<8x1xf32>
    %126 = vector.broadcast %118 : vector<8x1xf32> to vector<8x32xf32>
    %127 = arith.subf %114, %126 : vector<8x32xf32>
    %cst_77 = arith.constant 9.99999974E-6 : f32
    %128 = vector.broadcast %cst_77 : f32 to vector<8x1xf32>
    %129 = arith.addf %125, %128 : vector<8x1xf32>
    %130 = math.rsqrt %129 : vector<8x1xf32>
    %131 = vector.broadcast %130 : vector<8x1xf32> to vector<8x32xf32>
    %132 = arith.mulf %127, %131 : vector<8x32xf32>
    %c0_78 = arith.constant 0 : index
    %c0_79 = arith.constant 0 : index
    %133 = vector.load %arg8[%c0_78, %c0_79] : memref<8x1xf32, #tpu.memory_space<vmem>>, vector<8x1xf32>
    %134 = vector.broadcast %133 : vector<8x1xf32> to vector<8x32xf32>
    %135 = arith.mulf %132, %134 : vector<8x32xf32>
    %c0_80 = arith.constant 0 : index
    %c0_81 = arith.constant 0 : index
    %136 = vector.load %arg9[%c0_80, %c0_81] : memref<8x1xf32, #tpu.memory_space<vmem>>, vector<8x1xf32>
    %137 = vector.broadcast %136 : vector<8x1xf32> to vector<8x32xf32>
    %138 = arith.addf %135, %137 : vector<8x32xf32>
    %c0_82 = arith.constant 0 : index
    %c0_83 = arith.constant 0 : index
    %139 = vector.load %arg10[%c0_82, %c0_83] : memref<8x34xf32, #tpu.memory_space<vmem>>, vector<8x32xf32>
    tpu.vector_store %arg10[%c0_82, %c0_83], %138 {strides = array<i32>} : memref<8x34xf32, #tpu.memory_space<vmem>>, vector<8x32xf32>,
    return
  }
}

</mosaic_0001>

<bundles_post_ra>
// kernel: tpu_custom_call.1
= control target key start
LH: loop header
LB: loop body
LE: loop exit
PB: predicated region body
PF: predicated region fallthrough
CT: control target
= control target key end

     0   :  { %s604_s17 = smov 2   ;;  %v605_v3 = vmov 0.0   ;;  %vm606_vm0 = vmmov 0   ;;  %s777_s0 = inlined_call_operand.vmem [shape: f32[4,34], index: 0, kind: input, shape index: {}]   ;;  %s778_s1 = inlined_call_operand.vmem [shape: f32[3,32], index: 1, kind: input, shape index: {}]   ;;  %s779_s2 = inlined_call_operand.vmem [shape: bf16[3,8,4], index: 2, kind: input, shape index: {}]   ;;  %s780_s3 = inlined_call_operand.vmem [shape: f32[8,1], index: 3, kind: input, shape index: {}]   ;;  %s781_s4 = inlined_call_operand.vmem [shape: f32[8,1], index: 4, kind: input, shape index: {}]   ;;  %s782_s5 = inlined_call_operand.vmem [shape: f32[8,1], index: 5, kind: input, shape index: {}]   ;;  %s783_s6 = inlined_call_operand.vmem [shape: bf16[3,8,8], index: 6, kind: input, shape index: {}]   ;;  %s784_s7 = inlined_call_operand.vmem [shape: f32[8,1], index: 7, kind: input, shape index: {}]   ;;  %s785_s8 = inlined_call_operand.vmem [shape: f32[8,1], index: 8, kind: input, shape index: {}]   ;;  %s786_s9 = inlined_call_operand.vmem [shape: f32[8,1], index: 9, kind: input, shape index: {}]   ;;  %s787_s10 = inlined_call_operand.hbm [shape: f32[8,34], index: 10, kind: output, shape index: {}]  }
   0x1   :  { %v670_v0 = vld [vmem:[%s778_s1 + $0x2] ss:$0 sm:$0xff]  ;;  %528 = vmatprep.subr.bf16.mxu0 %v605_v3  ;;  %530 = vmatprep.mubr.msk.bf16.mxu0 %vm606_vm0, %v605_v3  ;;  %v683_v4 = vld [vmem:[%s778_s1] ss:$0 sm:$0xff] }
   0x2   :  { %v37_v1 = vld [vmem:[%s777_s0] sm:$0xf]  ;;  %152 = vrot.lane.b32.xlu0 %v670_v0, %s604_s17  ;;  %534 = vmatprep.subr.bf16.mxu1 %v605_v3 }
   0x3   :  { %v48_v2 = vpack.c.bf16 %v37_v1, %v37_v1  ;;  %v43_v5 = vmul.f32 %v683_v4, %v37_v1  ;;  %536 = vmatprep.mubr.msk.bf16.mxu1 %vm606_vm0, %v605_v3 }
   0x4   :  { %15 = vsyncpa [#allocation3], 0  ;;  %s607_s0 = smov 127   ;;  %vm56_vm1 = vcmask 1041408   ;;  %v44_v8 = vld [vmem:[%s779_s2] sm:$0xf] }
   0x5   :  { %v45_v6 = vpack.c.bf16 %v43_v5, %v43_v5  ;;  %vm52_vm2 = vcmask 31744   ;;  %v608_v9 = vmov 0   ;;  %s609_s1 = smov 126   ;;  %v503_v15 = vld [vmem:[%s779_s2 + $0x4] sm:$0xf]  ;;  %vm219_vm4 = vcmask 261120  }
   0x6   :  { %50 = vrot.lane.b32.xlu0 %v48_v2, %s607_s0  ;;  %572 = vset.pattern.permute.xlu1 %v608_v9  ;;  %v209_v16 = vld [vmem:[%s780_s3] sm:$0xff]  ;;  %v507_v23 = vld [vmem:[%s779_s2 + $0x8] sm:$0xf]  ;;  %vm249_vm5 = vcmask 7168   ;;  %vm251_vm6 = vcmask 277768   ;;  %vm257_vm7 = vcmask 269320  }
   0x7   :  { %v104_v7 = vsel %vm56_vm1, %v45_v6, 0  ;;  %573 = vset.pattern.permute.xlu0 %v608_v9  ;;  %v242_v41 = vld [vmem:[%s782_s5] sm:$0xff]  ;;  %250 = vst.msk [vmem:[#allocation2] sm:$0xff] %vm249_vm5, %v605_v3  ;;  %vm278_vm8 = vcmask 1043456   ;;  %vm274_vm9 = vcmask 64512  }
   0x8   :  { %535 = vmatpush3.bf16.msra.mxu1 %v104_v7  ;;  %v235_v42 = vld [vmem:[%s781_s4] sm:$0xff]  ;;  %252 = vst.msk [vmem:[#allocation2] sm:$0xff] %vm251_vm6, %v605_v3  ;;  %s610_s4 = smov 1  }
   0x9   :  { %546 = vmatprep.subr.bf16.mxu1 %v605_v3  ;;  %v431_v5 = vld [vmem:[%s784_s7] sm:$0xff] }
   0xa   :  { %v510_v7 = vld [vmem:[%s783_s6 + $0x4] sm:$0xf] }
   0xb   :  { %537 = vmatmul.mubr.msk.bf16.vlgmr.msra.gmra.mrb[0].mxu1 %vm52_vm2, %v44_v8 }
   0xc   :  { %548 = vmatprep.mubr.msk.bf16.mxu1 %vm606_vm0, %v605_v3 }
  0x74   :  { %v153_v10 = vpop.permute.xlu0 %152 }
  0x75   :  { %v155_v11 = vmul.f32 %v153_v10, %v37_v1  ;;  %v514_v10 = vld [vmem:[%s783_s6 + $0x8] sm:$0xf] }
  0x77   :  { %v158_v12 = vpack.c.bf16 %v155_v11, %v155_v11 }
  0x78   :  { %v51_v13 = vpop.permute.xlu0 %50 }
  0x79   :  { %160 = vrot.lane.b32.xlu1 %v158_v12, %s609_s1  ;;  %v58_v14 = vsel %vm56_vm1, %v51_v13, 0 }
  0x7a   :  { %529 = vmatpush3.bf16.msra.mxu0 %v58_v14 }
  0x7b   :  { %540 = vmatprep.subr.bf16.mxu0 %v605_v3 }
  0x7d   :  { %531 = vmatmul.mubr.msk.bf16.vlgmr.msra.gmra.mrb[0].mxu0 %vm52_vm2, %v503_v15  ;;  %212 = vperm.xlu1 %572, %v209_v16  }
  0x7e   :  { %542 = vmatprep.mubr.msk.bf16.mxu0 %vm606_vm0, %v605_v3 }
  0xde   :  { %v140_v17 = vpop.f32.mrb[0].mxu1 }
  0xdf   :  { %v538_v18 = vpop.f32.mrb[1].mxu1 }
  0xe0   :  { %v143_v19 = vpop.f32.mrb[2].mxu1 }
  0xe1   :  { %v539_v20 = vpop.f32.mrb[3].mxu1 }
  0xeb   :  { %v161_v21 = vpop.permute.xlu1 %160 }
  0xec   :  { %v166_v22 = vsel %vm56_vm1, %v161_v21, 0 }
  0xed   :  { %541 = vmatpush3.bf16.msra.mxu0 %v166_v22 }
  0xee   :  { %552 = vmatprep.subr.bf16.mxu0 %v605_v3 }
  0xf0   :  { %543 = vmatmul.mubr.msk.bf16.vlgmr.msra.gmra.mrb[4].mxu0 %vm52_vm2, %v507_v23 }
  0xf1   :  { %554 = vmatprep.mubr.msk.bf16.mxu0 %vm606_vm0, %v605_v3 }
  0xfc   :  { %v213_v30 = vpop.permute.xlu1 %212 }
 0x150   :  { %v94_v24 = vpop.f32.mrb[0].mxu0 }
 0x151   :  { %v532_v25 = vpop.f32.mrb[1].mxu0  ;;  %v141_v26 = vadd.f32 %v140_v17, %v94_v24 }
 0x152   :  { %v97_v27 = vpop.f32.mrb[2].mxu0 }
 0x153   :  { %v533_v28 = vpop.f32.mrb[3].mxu0 }
 0x1c3   :  { %v202_v29 = vpop.f32.mrb[4].mxu0 }
 0x1c4   :  { %v208_v31 = vadd.f32 %v202_v29, %v141_v26  ;;  %v544_v32 = vpop.f32.mrb[5].mxu0  ;;  %v460_v29 = vld [vmem:[%s786_s9] sm:$0xff] }
 0x1c5   :  { %v205_v33 = vpop.f32.mrb[6].mxu0 }
 0x1c6   :  { %v215_v34 = vadd.f32 %v213_v30, %v208_v31  ;;  %v545_v35 = vpop.f32.mrb[7].mxu0  ;;  %v453_v30 = vld [vmem:[%s785_s8] sm:$0xff]  ;;  %s611_s8 = smov [#allocation2]  }
 0x1c7   :  { %s494_s9 = sshll.u32 %s611_s8, 4  ;;  %s495_s9 = int_to_ptr.vmem [resolvable:$true] %s494_s9 }
 0x1c8   :  { %v217_v36 = vmul.f32 0.2, %v215_v34  ;;  %vm216_vm3 = vcmp.gt.f32.partialorder %v215_v34, 0.0  ;;  %s580_s19 = scalar_lea.vmem %s495_s9, 128  ;;  %p585_p1 = scmp.lt.s32.totalorder %s495_s9, %s495_s9 }
 0x1c9   :  { %p581_p0 = scmp.ne.s32.totalorder %s495_s9, %s580_s19  ;;  %p586_p2 = scmp.lt.s32.totalorder %s580_s19, %s580_s19 }
 0x1ca   :  { %v218_v37 = vsel %vm216_vm3, %v215_v34, %v217_v36 }
 0x1cb   :  { %v220_v38 = vsel %vm219_vm4, %v218_v37, 0.0  ;;  %v224_v39 = vmul.f32 %v218_v37, %v218_v37  ;;  %p587_p3 = por %p586_p2, %p585_p1 }
 0x1cc   :  { %221 = vadd.xlane.f32.xlu0 %v220_v38 }
 0x1cd   :  { %v225_v40 = vsel %vm219_vm4, %v224_v39, 0.0  ;;  %p588_p4 = pnand %p587_p3, %p581_p0 }
 0x1ce   :  { %226 = vadd.xlane.f32.xlu1 %v225_v40 }
 0x1df   :  { %245 = vperm.xlu1 %572, %v242_v41  }
 0x1e2   :  { %238 = vperm.xlu0 %573, %v235_v42  }
 0x259   :  { %v222_v43 = vpop.xlane.xlu0 %221 }
 0x25a   :  { %v223_v44 = vmul.f32 0.03125, %v222_v43 }
 0x25b   :  { %v227_v45 = vpop.xlane.xlu1 %226 }
 0x25c   :  { %v229_v46 = vmul.f32 %v223_v44, %v223_v44  ;;  %v228_v47 = vmul.f32 0.03125, %v227_v45  ;;  %v231_v50 = vsub.f32 %v218_v37, %v223_v44 }
 0x25e   :  { %v230_v48 = vsub.f32 %v228_v47, %v229_v46 }
 0x25f   :  { %v246_v55 = vpop.permute.xlu1 %245 }
 0x260   :  { %v232_v49 = vadd.f32 1e-05, %v230_v48 }
 0x261   :  { %v239_v52 = vpop.permute.xlu0 %238 }
 0x262   :  { %574 = vrsqrt.f32 %v232_v49 }
 0x26c   :  { %v575_v51 = vpop.eup %574 }
 0x26d   :  { %v234_v53 = vmul.f32 %v575_v51, %v231_v50 }
 0x26f   :  { %v241_v54 = vmul.f32 %v239_v52, %v234_v53 }
 0x271   :  { %v248_v56 = vadd.f32 %v246_v55, %v241_v54 }
 0x273   :  { %254 = vrot.lane.b32.xlu1 %v248_v56, %s610_s4 }
 0x277   :  { %374 = vrot.lane.b32.xlu1 %v670_v0, %s604_s17  ;;  %v266_v0 = vld [vmem:[%s783_s6] sm:$0xf] }
 0x2e5   :  { %v255_v57 = vpop.permute.xlu1 %254 }
 0x2e6   :  { %258 = vst.msk [vmem:[#allocation2] sm:$0xff] %vm257_vm7, %v255_v57 }
 0x2e9   :  { %v375_v58 = vpop.permute.xlu1 %374 }
 0x2ed   :  { %v259_v59 = vld [vmem:[#allocation2] sm:$0xff] }
 0x2ee   :  { %v377_v60 = vmul.f32 %v375_v58, %v259_v59  ;;  %v270_v61 = vpack.c.bf16 %v259_v59, %v259_v59  ;;  %v265_v62 = vmul.f32 %v683_v4, %v259_v59 }
 0x2f0   :  { %272 = vrot.lane.b32.xlu1 %v270_v61, %s607_s0  ;;  %v267_v63 = vpack.c.bf16 %v265_v62, %v265_v62  ;;  %v380_v1 = vpack.c.bf16 %v377_v60, %v377_v60 }
 0x2f2   :  { %v326_v2 = vsel %vm278_vm8, %v267_v63, 0 }
 0x2f3   :  { %553 = vmatpush3.bf16.msra.mxu0 %v326_v2 }
 0x2f4   :  { %382 = vrot.lane.b32.xlu1 %v380_v1, %s609_s1 }
 0x2f6   :  { %555 = vmatmul.mubr.msk.bf16.vlgmr.msra.gmra.mrb[8].mxu0 %vm274_vm9, %v266_v0 }
 0x2f8   :  { %434 = vperm.xlu1 %572, %v431_v5  }
 0x362   :  { %v273_v4 = vpop.permute.xlu1 %272 }
 0x363   :  { %v280_v6 = vsel %vm278_vm8, %v273_v4, 0 }
 0x364   :  { %547 = vmatpush3.bf16.msra.mxu1 %v280_v6 }
 0x365   :  { %558 = vmatprep.subr.bf16.mxu1 %v605_v3 }
 0x366   :  { %v383_v8 = vpop.permute.xlu1 %382 }
 0x367   :  { %v388_v9 = vsel %vm278_vm8, %v383_v8, 0  ;;  %549 = vmatmul.mubr.msk.bf16.vlgmr.msra.gmra.mrb[4].mxu1 %vm274_vm9, %v510_v7 }
 0x368   :  { %559 = vmatpush3.bf16.msra.mxu1 %v388_v9  ;;  %560 = vmatprep.mubr.msk.bf16.mxu1 %vm606_vm0, %v605_v3 }
 0x36f   :  { %561 = vmatmul.mubr.msk.bf16.vlgmr.msra.gmra.mrb[8].mxu1 %vm274_vm9, %v514_v10 }
 0x377   :  { %v435_v23 = vpop.permute.xlu1 %434 }
 0x3c9   :  { %v362_v11 = vpop.f32.mrb[8].mxu0 }
 0x3ca   :  { %v556_v12 = vpop.f32.mrb[9].mxu0 }
 0x3cb   :  { %v365_v13 = vpop.f32.mrb[10].mxu0 }
 0x3cc   :  { %v557_v14 = vpop.f32.mrb[11].mxu0 }
 0x43a   :  { %v316_v15 = vpop.f32.mrb[4].mxu1 }
 0x43b   :  { %v550_v16 = vpop.f32.mrb[5].mxu1  ;;  %v363_v17 = vadd.f32 %v362_v11, %v316_v15 }
 0x43c   :  { %v319_v18 = vpop.f32.mrb[6].mxu1 }
 0x43d   :  { %v551_v19 = vpop.f32.mrb[7].mxu1 }
 0x442   :  { %v424_v20 = vpop.f32.mrb[8].mxu1 }
 0x443   :  { %v430_v21 = vadd.f32 %v424_v20, %v363_v17  ;;  %v562_v22 = vpop.f32.mrb[9].mxu1 }
 0x444   :  { %v427_v3 = vpop.f32.mrb[10].mxu1 }
 0x445   :  { %v437_v24 = vadd.f32 %v435_v23, %v430_v21  ;;  %v563_v25 = vpop.f32.mrb[11].mxu1 }
 0x447   :  { %v438_v26 = vsel %vm219_vm4, %v437_v24, 0.0  ;;  %v442_v27 = vmul.f32 %v437_v24, %v437_v24 }
 0x448   :  { %439 = vadd.xlane.f32.xlu1 %v438_v26 }
 0x449   :  { %v443_v28 = vsel %vm219_vm4, %v442_v27, 0.0 }
 0x44a   :  { %444 = vadd.xlane.f32.xlu0 %v443_v28 }
 0x459   :  { %463 = vperm.xlu1 %572, %v460_v29  }
 0x460   :  { %456 = vperm.xlu0 %573, %v453_v30  }
 0x4d5   :  { %v440_v31 = vpop.xlane.xlu1 %439 }
 0x4d6   :  { %v441_v32 = vmul.f32 0.03125, %v440_v31 }
 0x4d7   :  { %v445_v33 = vpop.xlane.xlu0 %444 }
 0x4d8   :  { %v447_v34 = vmul.f32 %v441_v32, %v441_v32  ;;  %v446_v35 = vmul.f32 0.03125, %v445_v33  ;;  %v449_v38 = vsub.f32 %v437_v24, %v441_v32 }
 0x4d9   :  { %v464_v43 = vpop.permute.xlu1 %463 }
 0x4da   :  { %v448_v36 = vsub.f32 %v446_v35, %v447_v34 }
 0x4dc   :  { %v450_v37 = vadd.f32 1e-05, %v448_v36 }
 0x4de   :  { %576 = vrsqrt.f32 %v450_v37 }
 0x4df   :  { %v457_v41 = vpop.permute.xlu0 %456 }
 0x4e8   :  { %v577_v39 = vpop.eup %576 }
 0x4e9   :  { %v452_v40 = vmul.f32 %v577_v39, %v449_v38 }
 0x4eb   :  { %v459_v42 = vmul.f32 %v457_v41, %v452_v40 }
 0x4ed   :  { %v466_v44 = vadd.f32 %v464_v43, %v459_v42 }
 0x4ef   :  { %vm467_vm10 = vcmp.gt.f32.partialorder %v466_v44, 0.0  ;;  %v468_v45 = vmul.f32 0.2, %v466_v44 }
 0x4f1   :  { %v469_v46 = vsel %vm467_vm10, %v466_v44, %v468_v45 }
 0x4f2   :  { %v470_v47 = vsel %vm219_vm4, %v469_v46, 0.0  ;;  %v474_v48 = vmul.f32 %v469_v46, %v469_v46 }
 0x4f3   :  { %471 = vadd.xlane.f32.xlu1 %v470_v47 }
 0x4f4   :  { %v475_v49 = vsel %vm219_vm4, %v474_v48, 0.0 }
 0x4f5   :  { %476 = vadd.xlane.f32.xlu0 %v475_v49 }
 0x580   :  { %v472_v50 = vpop.xlane.xlu1 %471 }
 0x581   :  { %v473_v51 = vmul.f32 0.03125, %v472_v50 }
 0x582   :  { %v477_v52 = vpop.xlane.xlu0 %476 }
 0x583   :  { %v479_v53 = vmul.f32 %v473_v51, %v473_v51  ;;  %v478_v54 = vmul.f32 0.03125, %v477_v52  ;;  %v481_v57 = vsub.f32 %v469_v46, %v473_v51 }
 0x585   :  { %v480_v55 = vsub.f32 %v478_v54, %v479_v53 }
 0x587   :  { %v482_v56 = vadd.f32 1e-05, %v480_v55 }
 0x589   :  { %578 = vrsqrt.f32 %v482_v56 }
 0x593   :  { %v579_v58 = vpop.eup %578 }
 0x594   :  { %v484_v59 = vmul.f32 %v579_v58, %v481_v57 }
 0x596   :  { %v485_v60 = vmul.f32 %v484_v59, %v457_v41 }
 0x598   :  { %v486_v61 = vadd.f32 %v485_v60, %v464_v43 }
 0x59a   :  { %487 = vst.msk [vmem:[#allocation2] sm:$0xff] %vm219_vm4, %v486_v61 }
 0x59b   :  { %591 = shalt.err (!%p588_p4)
}
 0x59c   :  { %s592_s21 = scalar_lea.hbm %s787_s10, 128 }
 0x59d   :  { %p593_p5 = scmp.ne.s32.totalorder %s787_s10, %s592_s21  ;;  %p596_p6 = scmp.lt.u32.totalorder %s592_s21, %s787_s10 }
 0x59f   :  { %p598_p7 = pnand %p596_p6, %p593_p5 }
 0x5a1   :  { %601 = shalt.err (!%p598_p7)
}
 0x5a2   :  { %497 = dma.vmem_to_hbm [thread:$0]  %s495_s9, 128, %s787_s10, [#allocation3]  }
 0x5a3   :  { %602 = dma.done.wait [#allocation3], 128  }
 0x5a4   :  { %603 = vsyncadd [#allocation3], 4294967168 }
 0x5a5   :  { %501 = vsyncpa [#allocation3], 1 }

</bundles_post_ra>
